<compile_context>
chip_gen: v7x
topology: tpu7x:2x2x1
jax: 0.10.0
libtpu: 0.0.40
codegen_flags: <defaults>
</compile_context>

<pallas_src>
import functools

import jax
import jax.numpy as jnp
from jax.experimental import pallas as pl
from jax.experimental.pallas import tpu as pltpu


def _round_up(a: int, b: int) -> int:
    return (a + b - 1) // b * b


def _vmem_limit_bytes() -> int:
    # ~75% of physical VMEM: ~96 MiB on v5e/v6e (128 MiB), ~48 MiB on v7x (64 MiB).
    try:
        info = pltpu.get_tpu_info()
        cap = getattr(info, "vmem_capacity_bytes", None)
        if cap:
            return int(cap) * 3 // 4
    except Exception:
        pass
    return 48 * 1024 * 1024  # safe everywhere; plenty for Swin-size weights


def _hidden_dtype():
    # bf16 hidden/GELU on chips with a bf16 VPU/EUP (v6e, v7x); f32 on v5e & older.
    try:
        kind = jax.devices()[0].device_kind.lower()
    except Exception:
        return jnp.bfloat16
    for tag in ("v2", "v3", "v4", "v5"):
        if tag in kind:
            return jnp.float32
    return jnp.bfloat16


def _mlp_kernel(x_ref, g_ref, beta_ref, w1_ref, b1_ref, w2_ref, b2_ref, o_ref,
                *, hidden_dtype):
    x = x_ref[...].astype(jnp.float32)                         # (tm, C)
    inv_c = jnp.float32(1.0 / x.shape[-1])

    # --- LayerNorm (eps matches torch default 1e-5), reusing the centered value ---
    mean = jnp.sum(x, axis=-1, keepdims=True) * inv_c
    xc = x - mean
    var = jnp.sum(xc * xc, axis=-1, keepdims=True) * inv_c
    xn = xc * jax.lax.rsqrt(var + 1e-5) * g_ref[...] + beta_ref[...]

    # --- fc1: bf16 MXU inputs, f32 accumulation; GELU on the EUP ---
    h = jnp.dot(xn.astype(jnp.bfloat16), w1_ref[...],
                preferred_element_type=jnp.float32) + b1_ref[...]
    # TODO(synk): torch nn.GELU defaults to the erf form; tanh form differs by <~1e-3.
    h = jax.nn.gelu(h.astype(hidden_dtype), approximate=True)

    # --- fc2 ---
    y = jnp.dot(h.astype(jnp.bfloat16), w2_ref[...],
                preferred_element_type=jnp.float32) + b2_ref[...]

    # --- residual (dropout / drop_path with prob 0.0 are identity) ---
    o_ref[...] = (x + y).astype(o_ref.dtype)


def prepare_mlp_params(gamma, beta, w1, b1, w2, b2):
    """One-time (init-time) parameter prep: bf16 matmul weights, hidden dim padded
    to a multiple of 128 (zero pads contribute nothing through GELU(0)=0 and the
    zero rows of w2). Keeps the pad/convert HBM traffic out of the per-call path."""
    C, H = w1.shape
    Hp = _round_up(H, 128)
    f32 = jnp.float32
    g2d = gamma.astype(f32).reshape(1, C)
    be2d = beta.astype(f32).reshape(1, C)
    w1p = jnp.pad(w1.astype(jnp.bfloat16), ((0, 0), (0, Hp - H)))
    b1p = jnp.pad(b1.astype(f32).reshape(1, H), ((0, 0), (0, Hp - H)))
    w2p = jnp.pad(w2.astype(jnp.bfloat16), ((0, Hp - H), (0, 0)))
    b2p = b2.astype(f32).reshape(1, C)
    return g2d, be2d, w1p, b1p, w2p, b2p


def mlp_forward(x, params, *, tm=512):
    """x: (B, N, C) channel-last tokens; params from prepare_mlp_params.
    Returns (out, random_tensor=None), matching Mlp.forward_fn with drop_path=0."""
    g2d, be2d, w1p, b1p, w2p, b2p = params
    B, N, C = x.shape
    Hp = w1p.shape[1]
    M = B * N
    x2d = x.reshape(M, C)  # contiguous reshape; no HBM padding copy of activations

    # Row tile: large + 8-aligned, capped so the row grid has >=2 steps
    # (megacore sharding on v7x; DMA/compute overlap on single-core chips).
    # TODO(synk): for production Swin shapes on v6e, sweep tm up to 1024.
    tm_eff = min(tm, max(8, _round_up(pl.cdiv(M, 2), 8)))
    grid_m = pl.cdiv(M, tm_eff)

    kernel = functools.partial(_mlp_kernel, hidden_dtype=_hidden_dtype())

    # TODO(synk): if H grows well beyond Swin defaults, add an inner "arbitrary"
    # grid axis over Hp chunks with a (tm, C) f32 accumulator to bound VMEM.
    def run(single_buffer_weights: bool):
        def inv_spec(shape):
            kw = {}
            if single_buffer_weights and hasattr(pl, "Buffered"):
                # Grid-invariant operands: double-buffering them only burns VMEM.
                kw["pipeline_mode"] = pl.Buffered(1)
            return pl.BlockSpec(shape, lambda i: (0, 0), **kw)

        return pl.pallas_call(
            kernel,
            out_shape=jax.ShapeDtypeStruct((M, C), x.dtype),
            grid_spec=pltpu.PrefetchScalarGridSpec(
                num_scalar_prefetch=0,
                grid=(grid_m,),
                in_specs=[
                    pl.BlockSpec((tm_eff, C), lambda i: (i, 0)),  # x tile
                    inv_spec((1, C)),       # LayerNorm gamma
                    inv_spec((1, C)),       # LayerNorm beta
                    inv_spec((C, Hp)),      # fc1 weight (bf16)
                    inv_spec((1, Hp)),      # fc1 bias
                    inv_spec((Hp, C)),      # fc2 weight (bf16)
                    inv_spec((1, C)),       # fc2 bias
                ],
                out_specs=pl.BlockSpec((tm_eff, C), lambda i: (i, 0)),
            ),
            compiler_params=pltpu.CompilerParams(
                dimension_semantics=("parallel",),
                vmem_limit_bytes=_vmem_limit_bytes(),
            ),
        )(x2d, g2d, be2d, w1p, b1p, w2p, b2p)

    try:
        out2d = run(True)
    except Exception:
        # Fallback if this JAX build rejects single-buffered (Buffered(1)) specs.
        out2d = run(False)

    out = out2d.reshape(B, N, C)
    # drop_path_prob == 0.0 -> drop_path_op returns random_tensor unchanged (None).
    return out, None


def _reference(x, gamma, beta, w1, b1, w2, b2):
    xf = x.astype(jnp.float32)
    mean = jnp.mean(xf, axis=-1, keepdims=True)
    var = jnp.mean((xf - mean) ** 2, axis=-1, keepdims=True)
    xn = (xf - mean) * jax.lax.rsqrt(var + 1e-5) * gamma + beta
    h = jax.nn.gelu(xn @ w1 + b1, approximate=False)  # torch default erf GELU
    y = h @ w2 + b2
    return (xf + y).astype(x.dtype)


def _make_raw_params(key, C, H):
    ks = jax.random.split(key, 4)
    gamma = jnp.ones((C,), jnp.float32)
    beta = jnp.zeros((C,), jnp.float32)
    w1 = jax.random.normal(ks[0], (C, H), jnp.float32) * 0.02
    b1 = jax.random.normal(ks[1], (H,), jnp.float32) * 0.02
    w2 = jax.random.normal(ks[2], (H, C), jnp.float32) * 0.02
    b2 = jax.random.normal(ks[3], (C,), jnp.float32) * 0.02
    return gamma, beta, w1, b1, w2, b2


if __name__ == "__main__":
    key = jax.random.PRNGKey(0)
    k_main, k_x1, k_tail, k_x2 = jax.random.split(key, 4)

    # Main check: in_features=32, hidden_features=128, (B, N) tokens.
    B, N, C, H = 2, 64, 32, 128
    x = jax.random.normal(k_x1, (B, N, C), dtype=jnp.float32)
    raw = _make_raw_params(k_main, C, H)
    params = prepare_mlp_params(*raw)

    out, rand_tensor = mlp_forward(x, params)
    out = jax.block_until_ready(out)

    ref = _reference(x, *raw)
    assert rand_tensor is None
    assert out.shape == ref.shape
    # bf16 MXU inputs + tanh GELU vs f32/erf reference -> loose tolerance.
    assert jnp.allclose(out, ref, atol=2e-2, rtol=2e-2), "mismatch vs reference (main)"

    # Tail check: token count not a multiple of the row tile (partial last block),
    # C not a multiple of 128 (narrow-lane path).
    B2, N2, C2, H2 = 1, 49, 96, 384
    x2 = jax.random.normal(k_x2, (B2, N2, C2), dtype=jnp.float32)
    raw2 = _make_raw_params(k_tail, C2, H2)
    params2 = prepare_mlp_params(*raw2)
    out2, _ = mlp_forward(x2, params2)
    out2 = jax.block_until_ready(out2)
    ref2 = _reference(x2, *raw2)
    assert jnp.allclose(out2, ref2, atol=2e-2, rtol=2e-2), "mismatch vs reference (tail)"

    print("KERNEL_OK")
</pallas_src>

<mosaic_0001>
module attributes {stable_mosaic.version = 11 : i64} {
  func.func @_mlp_kernel(%arg0: i32, %arg1: memref<64x32xf32, #tpu.memory_space<vmem>>, %arg2: memref<1x32xf32, #tpu.memory_space<vmem>>, %arg3: memref<1x32xf32, #tpu.memory_space<vmem>>, %arg4: memref<32x128xbf16, #tpu.memory_space<vmem>>, %arg5: memref<1x128xf32, #tpu.memory_space<vmem>>, %arg6: memref<128x32xbf16, #tpu.memory_space<vmem>>, %arg7: memref<1x32xf32, #tpu.memory_space<vmem>>, %arg8: memref<64x32xf32, #tpu.memory_space<vmem>>) attributes {dimension_semantics = [#tpu.dimension_semantics<parallel>], iteration_bounds = array<i64: 2>, scalar_prefetch = 0 : i64, scratch_operands = 0 : i64, tpu.core_type = #tpu.core_type<tc>, window_params = [{transform_indices = @transform_0, window_bounds = array<i64: 64, 32>}, {pipeline_mode = #tpu.pipeline_mode<synchronous>, transform_indices = @transform_1, window_bounds = array<i64: 1, 32>}, {pipeline_mode = #tpu.pipeline_mode<synchronous>, transform_indices = @transform_2, window_bounds = array<i64: 1, 32>}, {pipeline_mode = #tpu.pipeline_mode<synchronous>, transform_indices = @transform_3, window_bounds = array<i64: 32, 128>}, {pipeline_mode = #tpu.pipeline_mode<synchronous>, transform_indices = @transform_4, window_bounds = array<i64: 1, 128>}, {pipeline_mode = #tpu.pipeline_mode<synchronous>, transform_indices = @transform_5, window_bounds = array<i64: 128, 32>}, {pipeline_mode = #tpu.pipeline_mode<synchronous>, transform_indices = @transform_6, window_bounds = array<i64: 1, 32>}, {transform_indices = @transform_7, window_bounds = array<i64: 64, 32>}]} {
    %c0 = arith.constant 0 : index
    %c0_0 = arith.constant 0 : index
    %0 = vector.load %arg1[%c0, %c0_0] : memref<64x32xf32, #tpu.memory_space<vmem>>, vector<64x32xf32>
    %cst = arith.constant dense<0.000000e+00> : vector<64xf32>
    %1 = vector.multi_reduction <add>, %0, %cst [1] : vector<64x32xf32> to vector<64xf32>
    %2 = vector.shape_cast %1 : vector<64xf32> to vector<64x1xf32>
    %cst_1 = arith.constant 3.125000e-02 : f32
    %3 = vector.broadcast %cst_1 : f32 to vector<64x1xf32>
    %4 = arith.mulf %2, %3 : vector<64x1xf32>
    %5 = vector.broadcast %4 : vector<64x1xf32> to vector<64x32xf32>
    %6 = arith.subf %0, %5 : vector<64x32xf32>
    %7 = arith.mulf %6, %6 : vector<64x32xf32>
    %cst_2 = arith.constant dense<0.000000e+00> : vector<64xf32>
    %8 = vector.multi_reduction <add>, %7, %cst_2 [1] : vector<64x32xf32> to vector<64xf32>
    %9 = vector.shape_cast %8 : vector<64xf32> to vector<64x1xf32>
    %cst_3 = arith.constant 3.125000e-02 : f32
    %10 = vector.broadcast %cst_3 : f32 to vector<64x1xf32>
    %11 = arith.mulf %9, %10 : vector<64x1xf32>
    %cst_4 = arith.constant 9.99999974E-6 : f32
    %12 = vector.broadcast %cst_4 : f32 to vector<64x1xf32>
    %13 = arith.addf %11, %12 : vector<64x1xf32>
    %14 = math.rsqrt %13 : vector<64x1xf32>
    %15 = vector.broadcast %14 : vector<64x1xf32> to vector<64x32xf32>
    %16 = arith.mulf %6, %15 : vector<64x32xf32>
    %c0_5 = arith.constant 0 : index
    %c0_6 = arith.constant 0 : index
    %17 = vector.load %arg2[%c0_5, %c0_6] : memref<1x32xf32, #tpu.memory_space<vmem>>, vector<1x32xf32>
    %18 = vector.broadcast %17 : vector<1x32xf32> to vector<64x32xf32>
    %19 = arith.mulf %16, %18 : vector<64x32xf32>
    %c0_7 = arith.constant 0 : index
    %c0_8 = arith.constant 0 : index
    %20 = vector.load %arg3[%c0_7, %c0_8] : memref<1x32xf32, #tpu.memory_space<vmem>>, vector<1x32xf32>
    %21 = vector.broadcast %20 : vector<1x32xf32> to vector<64x32xf32>
    %22 = arith.addf %19, %21 : vector<64x32xf32>
    %23 = arith.truncf %22 : vector<64x32xf32> to vector<64x32xbf16>
    %c0_9 = arith.constant 0 : index
    %c0_10 = arith.constant 0 : index
    %24 = vector.load %arg4[%c0_9, %c0_10] : memref<32x128xbf16, #tpu.memory_space<vmem>>, vector<32x128xbf16>
    %cst_11 = arith.constant dense<0.000000e+00> : vector<64x128xf32>
    %25 = tpu.matmul %23, %24, %cst_11 {dimension_numbers = #tpu.dot_dimension_numbers<[1], [0], [0], [1], [0, 0, 1, 1], [], []>} : vector<64x32xbf16>, vector<32x128xbf16>, vector<64x128xf32> -> vector<64x128xf32>
    %c0_12 = arith.constant 0 : index
    %c0_13 = arith.constant 0 : index
    %26 = vector.load %arg5[%c0_12, %c0_13] : memref<1x128xf32, #tpu.memory_space<vmem>>, vector<1x128xf32>
    %27 = vector.broadcast %26 : vector<1x128xf32> to vector<64x128xf32>
    %28 = arith.addf %25, %27 : vector<64x128xf32>
    %29 = arith.truncf %28 : vector<64x128xf32> to vector<64x128xbf16>
    %30 = arith.mulf %29, %29 : vector<64x128xbf16>
    %31 = arith.mulf %29, %30 : vector<64x128xbf16>
    %cst_14 = arith.constant 4.467770e-02 : bf16
    %32 = vector.broadcast %cst_14 : bf16 to vector<64x128xbf16>
    %33 = arith.mulf %32, %31 : vector<64x128xbf16>
    %34 = arith.addf %29, %33 : vector<64x128xbf16>
    %cst_15 = arith.constant 7.968750e-01 : bf16
    %35 = vector.broadcast %cst_15 : bf16 to vector<64x128xbf16>
    %36 = arith.mulf %35, %34 : vector<64x128xbf16>
    %37 = math.tanh %36 : vector<64x128xbf16>
    %cst_16 = arith.constant 1.000000e+00 : bf16
    %38 = vector.broadcast %cst_16 : bf16 to vector<64x128xbf16>
    %39 = arith.addf %38, %37 : vector<64x128xbf16>
    %cst_17 = arith.constant 5.000000e-01 : bf16
    %40 = vector.broadcast %cst_17 : bf16 to vector<64x128xbf16>
    %41 = arith.mulf %40, %39 : vector<64x128xbf16>
    %42 = arith.mulf %29, %41 : vector<64x128xbf16>
    %c0_18 = arith.constant 0 : index
    %c0_19 = arith.constant 0 : index
    %43 = vector.load %arg6[%c0_18, %c0_19] : memref<128x32xbf16, #tpu.memory_space<vmem>>, vector<128x32xbf16>
    %cst_20 = arith.constant dense<0.000000e+00> : vector<64x32xf32>
    %44 = tpu.matmul %42, %43, %cst_20 {dimension_numbers = #tpu.dot_dimension_numbers<[1], [0], [0], [1], [0, 0, 1, 1], [], []>} : vector<64x128xbf16>, vector<128x32xbf16>, vector<64x32xf32> -> vector<64x32xf32>
    %c0_21 = arith.constant 0 : index
    %c0_22 = arith.constant 0 : index
    %45 = vector.load %arg7[%c0_21, %c0_22] : memref<1x32xf32, #tpu.memory_space<vmem>>, vector<1x32xf32>
    %46 = vector.broadcast %45 : vector<1x32xf32> to vector<64x32xf32>
    %47 = arith.addf %44, %46 : vector<64x32xf32>
    %48 = arith.addf %0, %47 : vector<64x32xf32>
    %c0_23 = arith.constant 0 : index
    %c0_24 = arith.constant 0 : index
    %49 = vector.load %arg8[%c0_23, %c0_24] : memref<64x32xf32, #tpu.memory_space<vmem>>, vector<64x32xf32>
    tpu.vector_store %arg8[%c0_23, %c0_24], %48 {strides = array<i32>} : memref<64x32xf32, #tpu.memory_space<vmem>>, vector<64x32xf32>,
    return
  }
  func.func @transform_0(%arg0: i32) -> (i32, i32) {
    %c0_i32 = arith.constant 0 : i32
    %c0_i32_0 = arith.constant 0 : i32
    return %arg0, %c0_i32 : i32, i32
  }
  func.func @transform_1(%arg0: i32) -> (i32, i32) {
    %c0_i32 = arith.constant 0 : i32
    %c0_i32_0 = arith.constant 0 : i32
    %c0_i32_1 = arith.constant 0 : i32
    return %c0_i32, %c0_i32_0 : i32, i32
  }
  func.func @transform_2(%arg0: i32) -> (i32, i32) {
    %c0_i32 = arith.constant 0 : i32
    %c0_i32_0 = arith.constant 0 : i32
    %c0_i32_1 = arith.constant 0 : i32
    return %c0_i32, %c0_i32_0 : i32, i32
  }
  func.func @transform_3(%arg0: i32) -> (i32, i32) {
    %c0_i32 = arith.constant 0 : i32
    %c0_i32_0 = arith.constant 0 : i32
    %c0_i32_1 = arith.constant 0 : i32
    return %c0_i32, %c0_i32_0 : i32, i32
  }
  func.func @transform_4(%arg0: i32) -> (i32, i32) {
    %c0_i32 = arith.constant 0 : i32
    %c0_i32_0 = arith.constant 0 : i32
    %c0_i32_1 = arith.constant 0 : i32
    return %c0_i32, %c0_i32_0 : i32, i32
  }
  func.func @transform_5(%arg0: i32) -> (i32, i32) {
    %c0_i32 = arith.constant 0 : i32
    %c0_i32_0 = arith.constant 0 : i32
    %c0_i32_1 = arith.constant 0 : i32
    return %c0_i32, %c0_i32_0 : i32, i32
  }
  func.func @transform_6(%arg0: i32) -> (i32, i32) {
    %c0_i32 = arith.constant 0 : i32
    %c0_i32_0 = arith.constant 0 : i32
    %c0_i32_1 = arith.constant 0 : i32
    return %c0_i32, %c0_i32_0 : i32, i32
  }
  func.func @transform_7(%arg0: i32) -> (i32, i32) {
    %c0_i32 = arith.constant 0 : i32
    %c0_i32_0 = arith.constant 0 : i32
    return %arg0, %c0_i32 : i32, i32
  }
}

module attributes {stable_mosaic.version = 11 : i64} {
  func.func @_mlp_kernel(%arg0: i32, %arg1: memref<64x32xf32, #tpu.memory_space<vmem>>, %arg2: memref<1x32xf32, #tpu.memory_space<vmem>>, %arg3: memref<1x32xf32, #tpu.memory_space<vmem>>, %arg4: memref<32x128xbf16, #tpu.memory_space<vmem>>, %arg5: memref<1x128xf32, #tpu.memory_space<vmem>>, %arg6: memref<128x32xbf16, #tpu.memory_space<vmem>>, %arg7: memref<1x32xf32, #tpu.memory_space<vmem>>, %arg8: memref<64x32xf32, #tpu.memory_space<vmem>>) attributes {dimension_semantics = [#tpu.dimension_semantics<parallel>], iteration_bounds = array<i64: 2>, scalar_prefetch = 0 : i64, scratch_operands = 0 : i64, tpu.core_type = #tpu.core_type<tc>, window_params = [{transform_indices = @transform_0, window_bounds = array<i64: 64, 32>}, {pipeline_mode = #tpu.pipeline_mode<synchronous>, transform_indices = @transform_1, window_bounds = array<i64: 1, 32>}, {pipeline_mode = #tpu.pipeline_mode<synchronous>, transform_indices = @transform_2, window_bounds = array<i64: 1, 32>}, {pipeline_mode = #tpu.pipeline_mode<synchronous>, transform_indices = @transform_3, window_bounds = array<i64: 32, 128>}, {pipeline_mode = #tpu.pipeline_mode<synchronous>, transform_indices = @transform_4, window_bounds = array<i64: 1, 128>}, {pipeline_mode = #tpu.pipeline_mode<synchronous>, transform_indices = @transform_5, window_bounds = array<i64: 128, 32>}, {pipeline_mode = #tpu.pipeline_mode<synchronous>, transform_indices = @transform_6, window_bounds = array<i64: 1, 32>}, {transform_indices = @transform_7, window_bounds = array<i64: 64, 32>}]} {
    %c0 = arith.constant 0 : index
    %c0_0 = arith.constant 0 : index
    %0 = vector.load %arg1[%c0, %c0_0] : memref<64x32xf32, #tpu.memory_space<vmem>>, vector<64x32xf32>
    %cst = arith.constant dense<0.000000e+00> : vector<64xf32>
    %1 = vector.multi_reduction <add>, %0, %cst [1] : vector<64x32xf32> to vector<64xf32>
    %2 = vector.shape_cast %1 : vector<64xf32> to vector<64x1xf32>
    %cst_1 = arith.constant 3.125000e-02 : f32
    %3 = vector.broadcast %cst_1 : f32 to vector<64x1xf32>
    %4 = arith.mulf %2, %3 : vector<64x1xf32>
    %5 = vector.broadcast %4 : vector<64x1xf32> to vector<64x32xf32>
    %6 = arith.subf %0, %5 : vector<64x32xf32>
    %7 = arith.mulf %6, %6 : vector<64x32xf32>
    %cst_2 = arith.constant dense<0.000000e+00> : vector<64xf32>
    %8 = vector.multi_reduction <add>, %7, %cst_2 [1] : vector<64x32xf32> to vector<64xf32>
    %9 = vector.shape_cast %8 : vector<64xf32> to vector<64x1xf32>
    %cst_3 = arith.constant 3.125000e-02 : f32
    %10 = vector.broadcast %cst_3 : f32 to vector<64x1xf32>
    %11 = arith.mulf %9, %10 : vector<64x1xf32>
    %cst_4 = arith.constant 9.99999974E-6 : f32
    %12 = vector.broadcast %cst_4 : f32 to vector<64x1xf32>
    %13 = arith.addf %11, %12 : vector<64x1xf32>
    %14 = math.rsqrt %13 : vector<64x1xf32>
    %15 = vector.broadcast %14 : vector<64x1xf32> to vector<64x32xf32>
    %16 = arith.mulf %6, %15 : vector<64x32xf32>
    %c0_5 = arith.constant 0 : index
    %c0_6 = arith.constant 0 : index
    %17 = vector.load %arg2[%c0_5, %c0_6] : memref<1x32xf32, #tpu.memory_space<vmem>>, vector<1x32xf32>
    %18 = vector.broadcast %17 : vector<1x32xf32> to vector<64x32xf32>
    %19 = arith.mulf %16, %18 : vector<64x32xf32>
    %c0_7 = arith.constant 0 : index
    %c0_8 = arith.constant 0 : index
    %20 = vector.load %arg3[%c0_7, %c0_8] : memref<1x32xf32, #tpu.memory_space<vmem>>, vector<1x32xf32>
    %21 = vector.broadcast %20 : vector<1x32xf32> to vector<64x32xf32>
    %22 = arith.addf %19, %21 : vector<64x32xf32>
    %23 = arith.truncf %22 : vector<64x32xf32> to vector<64x32xbf16>
    %c0_9 = arith.constant 0 : index
    %c0_10 = arith.constant 0 : index
    %24 = vector.load %arg4[%c0_9, %c0_10] : memref<32x128xbf16, #tpu.memory_space<vmem>>, vector<32x128xbf16>
    %cst_11 = arith.constant dense<0.000000e+00> : vector<64x128xf32>
    %25 = tpu.matmul %23, %24, %cst_11 {dimension_numbers = #tpu.dot_dimension_numbers<[1], [0], [0], [1], [0, 0, 1, 1], [], []>} : vector<64x32xbf16>, vector<32x128xbf16>, vector<64x128xf32> -> vector<64x128xf32>
    %c0_12 = arith.constant 0 : index
    %c0_13 = arith.constant 0 : index
    %26 = vector.load %arg5[%c0_12, %c0_13] : memref<1x128xf32, #tpu.memory_space<vmem>>, vector<1x128xf32>
    %27 = vector.broadcast %26 : vector<1x128xf32> to vector<64x128xf32>
    %28 = arith.addf %25, %27 : vector<64x128xf32>
    %29 = arith.truncf %28 : vector<64x128xf32> to vector<64x128xbf16>
    %30 = arith.mulf %29, %29 : vector<64x128xbf16>
    %31 = arith.mulf %29, %30 : vector<64x128xbf16>
    %cst_14 = arith.constant 4.467770e-02 : bf16
    %32 = vector.broadcast %cst_14 : bf16 to vector<64x128xbf16>
    %33 = arith.mulf %32, %31 : vector<64x128xbf16>
    %34 = arith.addf %29, %33 : vector<64x128xbf16>
    %cst_15 = arith.constant 7.968750e-01 : bf16
    %35 = vector.broadcast %cst_15 : bf16 to vector<64x128xbf16>
    %36 = arith.mulf %35, %34 : vector<64x128xbf16>
    %37 = math.tanh %36 : vector<64x128xbf16>
    %cst_16 = arith.constant 1.000000e+00 : bf16
    %38 = vector.broadcast %cst_16 : bf16 to vector<64x128xbf16>
    %39 = arith.addf %38, %37 : vector<64x128xbf16>
    %cst_17 = arith.constant 5.000000e-01 : bf16
    %40 = vector.broadcast %cst_17 : bf16 to vector<64x128xbf16>
    %41 = arith.mulf %40, %39 : vector<64x128xbf16>
    %42 = arith.mulf %29, %41 : vector<64x128xbf16>
    %c0_18 = arith.constant 0 : index
    %c0_19 = arith.constant 0 : index
    %43 = vector.load %arg6[%c0_18, %c0_19] : memref<128x32xbf16, #tpu.memory_space<vmem>>, vector<128x32xbf16>
    %cst_20 = arith.constant dense<0.000000e+00> : vector<64x32xf32>
    %44 = tpu.matmul %42, %43, %cst_20 {dimension_numbers = #tpu.dot_dimension_numbers<[1], [0], [0], [1], [0, 0, 1, 1], [], []>} : vector<64x128xbf16>, vector<128x32xbf16>, vector<64x32xf32> -> vector<64x32xf32>
    %c0_21 = arith.constant 0 : index
    %c0_22 = arith.constant 0 : index
    %45 = vector.load %arg7[%c0_21, %c0_22] : memref<1x32xf32, #tpu.memory_space<vmem>>, vector<1x32xf32>
    %46 = vector.broadcast %45 : vector<1x32xf32> to vector<64x32xf32>
    %47 = arith.addf %44, %46 : vector<64x32xf32>
    %48 = arith.addf %0, %47 : vector<64x32xf32>
    %c0_23 = arith.constant 0 : index
    %c0_24 = arith.constant 0 : index
    %49 = vector.load %arg8[%c0_23, %c0_24] : memref<64x32xf32, #tpu.memory_space<vmem>>, vector<64x32xf32>
    tpu.vector_store %arg8[%c0_23, %c0_24], %48 {strides = array<i32>} : memref<64x32xf32, #tpu.memory_space<vmem>>, vector<64x32xf32>,
    return
  }
  func.func @transform_0(%arg0: i32) -> (i32, i32) {
    %c0_i32 = arith.constant 0 : i32
    %c0_i32_0 = arith.constant 0 : i32
    return %arg0, %c0_i32 : i32, i32
  }
  func.func @transform_1(%arg0: i32) -> (i32, i32) {
    %c0_i32 = arith.constant 0 : i32
    %c0_i32_0 = arith.constant 0 : i32
    %c0_i32_1 = arith.constant 0 : i32
    return %c0_i32, %c0_i32_0 : i32, i32
  }
  func.func @transform_2(%arg0: i32) -> (i32, i32) {
    %c0_i32 = arith.constant 0 : i32
    %c0_i32_0 = arith.constant 0 : i32
    %c0_i32_1 = arith.constant 0 : i32
    return %c0_i32, %c0_i32_0 : i32, i32
  }
  func.func @transform_3(%arg0: i32) -> (i32, i32) {
    %c0_i32 = arith.constant 0 : i32
    %c0_i32_0 = arith.constant 0 : i32
    %c0_i32_1 = arith.constant 0 : i32
    return %c0_i32, %c0_i32_0 : i32, i32
  }
  func.func @transform_4(%arg0: i32) -> (i32, i32) {
    %c0_i32 = arith.constant 0 : i32
    %c0_i32_0 = arith.constant 0 : i32
    %c0_i32_1 = arith.constant 0 : i32
    return %c0_i32, %c0_i32_0 : i32, i32
  }
  func.func @transform_5(%arg0: i32) -> (i32, i32) {
    %c0_i32 = arith.constant 0 : i32
    %c0_i32_0 = arith.constant 0 : i32
    %c0_i32_1 = arith.constant 0 : i32
    return %c0_i32, %c0_i32_0 : i32, i32
  }
  func.func @transform_6(%arg0: i32) -> (i32, i32) {
    %c0_i32 = arith.constant 0 : i32
    %c0_i32_0 = arith.constant 0 : i32
    %c0_i32_1 = arith.constant 0 : i32
    return %c0_i32, %c0_i32_0 : i32, i32
  }
  func.func @transform_7(%arg0: i32) -> (i32, i32) {
    %c0_i32 = arith.constant 0 : i32
    %c0_i32_0 = arith.constant 0 : i32
    return %arg0, %c0_i32 : i32, i32
  }
}

</mosaic_0001>

<bundles_post_ra>
// kernel: tpu_custom_call.1
= control target key start
LH: loop header
LB: loop body
LE: loop exit
PB: predicated region body
PF: predicated region fallthrough
CT: control target
= control target key end

     0   :  { %s955_s24 = smov 0   ;;  %s1129_s0 = inlined_call_operand.vmem [shape: f32[128,32], index: 0, kind: input, shape index: {}]   ;;  %s1130_s1 = inlined_call_operand.vmem [shape: f32[1,32], index: 1, kind: input, shape index: {}]   ;;  %s1131_s2 = inlined_call_operand.vmem [shape: f32[1,32], index: 2, kind: input, shape index: {}]   ;;  %s1132_s3 = inlined_call_operand.vmem [shape: bf16[32,128], index: 3, kind: input, shape index: {}]   ;;  %s1133_s4 = inlined_call_operand.vmem [shape: f32[1,128], index: 4, kind: input, shape index: {}]   ;;  %s1134_s5 = inlined_call_operand.vmem [shape: bf16[128,32], index: 5, kind: input, shape index: {}]   ;;  %s1135_s6 = inlined_call_operand.vmem [shape: f32[1,32], index: 6, kind: input, shape index: {}]   ;;  %s1136_s7 = inlined_call_operand.vmem [shape: f32[128,32], index: 7, kind: output, shape index: {}]  }
   0x1 LB: > { %s782_s25 = sadd.s32 4294967295, %s913_s24   ;;  %p786_p0 = scmp.ge.s32.totalorder %s913_s24, 1  ;;  %s913_s24 = sphi %s955_s24, %s17_s24  }
   0x2   : > { %p238_p1 = scmp.lt.s32.totalorder %s913_s24, 3 }
   0x4   : > { %p239_p2 = pnand %p786_p0, %p238_p1 }
   0x5   : > { %s787_s26 = sshll.u32 (!%p239_p2), %s782_s25, 3  ;;  %vm295_vm0 = vcmask (!%p239_p2), 261120   ;;  %v873_v56 = vld [vmem:[%s1132_s3] sm:$0xff] (!%p239_p2)   ;;  %v874_v57 = vld [vmem:[%s1132_s3 + $0x8] sm:$0xff] (!%p239_p2)  }
   0x6   : > { %242 = sbr.rel (%p239_p2) target bundleno = 816 (0x330), region = 48  ;;  %p271_p3 = scmp.lt.s32.totalorder (!%p239_p2), %s787_s26, 15  ;;  %829 = vmatprep.subr.bf16.mxu0 (!%p239_p2), %v873_v56 }
   0x7   : > { %830 = vmatpush3.bf16.msra.mxu0 (!%p239_p2), %v873_v56 }
   0x8   : > { %831 = vmatprep.subr.bf16.mxu0 (!%p239_p2), %v874_v57 }
   0xb   : > { %832 = vmatpush3.bf16.msra.mxu0 (!%p239_p2), %v874_v57 }
   0xd   : > { %s1138_s26 = smov (!%p271_p3, %s787_s26), 15 }
   0xe   : > { %s788_s27 = sshll.u32 %s1138_s26, 3 }
   0xf   : > { %s274_s30 = scalar_lea.vmem %s1129_s0, %s788_s27  ;;  %s280_s18 = scalar_lea.vmem %s1136_s7, %s788_s27 }
  0x10   : > { %v971_v0 = vld [vmem:[%s274_s30] sm:$0xff]  ;;  %v973_v1 = vld [vmem:[%s274_s30 + $0x10] sm:$0xff]  ;;  %v975_v2 = vld [vmem:[%s274_s30 + $0x8] sm:$0xff] }
  0x11   : > { %v296_v3 = vsel %vm295_vm0, %v971_v0, 0.0  ;;  %v302_v4 = vsel %vm295_vm0, %v973_v1, 0.0  ;;  %v981_v5 = vld [vmem:[%s274_s30 + $0x18] sm:$0xff]  ;;  %v299_v6 = vsel %vm295_vm0, %v975_v2, 0.0  ;;  %v987_v8 = vld [vmem:[%s274_s30 + $0x20] sm:$0xff]  ;;  %v989_v9 = vld [vmem:[%s274_s30 + $0x28] sm:$0xff] }
  0x12   : > { %297 = vadd.xlane.f32.xlu0 %v296_v3  ;;  %303 = vadd.xlane.f32.xlu1 %v302_v4  ;;  %v305_v7 = vsel %vm295_vm0, %v981_v5, 0.0  ;;  %v308_v10 = vsel %vm295_vm0, %v987_v8, 0.0  ;;  %v311_v11 = vsel %vm295_vm0, %v989_v9, 0.0  ;;  %v995_v12 = vld [vmem:[%s274_s30 + $0x30] sm:$0xff]  ;;  %v997_v13 = vld [vmem:[%s274_s30 + $0x38] sm:$0xff] }
  0x13   : > { %v314_v14 = vsel %vm295_vm0, %v995_v12, 0.0  ;;  %v317_v15 = vsel %vm295_vm0, %v997_v13, 0.0 }
  0x16   : > { %300 = vadd.xlane.f32.xlu0 %v299_v6  ;;  %306 = vadd.xlane.f32.xlu1 %v305_v7 }
  0x1a   : > { %309 = vadd.xlane.f32.xlu0 %v308_v10  ;;  %312 = vadd.xlane.f32.xlu1 %v311_v11 }
  0x1e   : > { %315 = vadd.xlane.f32.xlu0 %v314_v14  ;;  %318 = vadd.xlane.f32.xlu1 %v317_v15 }
  0x9f   : > { %v298_v16 = vpop.xlane.xlu0 %297  ;;  %v304_v17 = vpop.xlane.xlu1 %303 }
  0xa0   : > { %v320_v18 = vmul.f32 0.03125, %v298_v16  ;;  %v322_v19 = vmul.f32 0.03125, %v304_v17 }
  0xa2   : > { %v1004_v20 = vsub.f32 %v971_v0, %v320_v18  ;;  %v1007_v21 = vsub.f32 %v973_v1, %v322_v19 }
  0xa3   : > { %v301_v22 = vpop.xlane.xlu0 %300  ;;  %v307_v23 = vpop.xlane.xlu1 %306 }
  0xa4   : > { %v321_v24 = vmul.f32 0.03125, %v301_v22  ;;  %v323_v25 = vmul.f32 0.03125, %v307_v23  ;;  %v336_v26 = vmul.f32 %v1004_v20, %v1004_v20  ;;  %v338_v27 = vmul.f32 %v1007_v21, %v1007_v21 }
  0xa6   : > { %v1014_v28 = vsub.f32 %v975_v2, %v321_v24  ;;  %v1017_v29 = vsub.f32 %v981_v5, %v323_v25  ;;  %v344_v30 = vsel %vm295_vm0, %v336_v26, 0.0  ;;  %v350_v33 = vsel %vm295_vm0, %v338_v27, 0.0 }
  0xa7   : > { %345 = vadd.xlane.f32.xlu0 %v344_v30  ;;  %v310_v31 = vpop.xlane.xlu0 %309  ;;  %v313_v32 = vpop.xlane.xlu1 %312 }
  0xa8   : > { %v324_v34 = vmul.f32 0.03125, %v310_v31  ;;  %v325_v35 = vmul.f32 0.03125, %v313_v32  ;;  %v337_v36 = vmul.f32 %v1014_v28, %v1014_v28  ;;  %v339_v37 = vmul.f32 %v1017_v29, %v1017_v29  ;;  %v791_v31 = vld [vmem:[%s1130_s1] ss:$0 sm:$0xff] }
  0xaa   : > { %v1026_v38 = vsub.f32 %v987_v8, %v324_v34  ;;  %v1029_v39 = vsub.f32 %v989_v9, %v325_v35  ;;  %v347_v40 = vsel %vm295_vm0, %v337_v36, 0.0  ;;  %v353_v43 = vsel %vm295_vm0, %v339_v37, 0.0 }
  0xab   : > { %351 = vadd.xlane.f32.xlu0 %v350_v33  ;;  %348 = vadd.xlane.f32.xlu1 %v347_v40  ;;  %v316_v41 = vpop.xlane.xlu0 %315  ;;  %v319_v42 = vpop.xlane.xlu1 %318 }
  0xac   : > { %v326_v44 = vmul.f32 0.03125, %v316_v41  ;;  %v327_v45 = vmul.f32 0.03125, %v319_v42  ;;  %v340_v46 = vmul.f32 %v1026_v38, %v1026_v38  ;;  %v341_v47 = vmul.f32 %v1029_v39, %v1029_v39 }
  0xae   : > { %v1038_v48 = vsub.f32 %v995_v12, %v326_v44  ;;  %v1041_v49 = vsub.f32 %v997_v13, %v327_v45  ;;  %v356_v50 = vsel %vm295_vm0, %v340_v46, 0.0  ;;  %v359_v51 = vsel %vm295_vm0, %v341_v47, 0.0 }
  0xaf   : > { %354 = vadd.xlane.f32.xlu1 %v353_v43  ;;  %357 = vadd.xlane.f32.xlu0 %v356_v50 }
  0xb0   : > { %v342_v52 = vmul.f32 %v1038_v48, %v1038_v48  ;;  %v343_v53 = vmul.f32 %v1041_v49, %v1041_v49 }
  0xb2   : > { %v362_v54 = vsel %vm295_vm0, %v342_v52, 0.0  ;;  %v365_v55 = vsel %vm295_vm0, %v343_v53, 0.0 }
  0xb3   : > { %360 = vadd.xlane.f32.xlu1 %v359_v51  ;;  %363 = vadd.xlane.f32.xlu0 %v362_v54 }
  0xb7   : > { %366 = vadd.xlane.f32.xlu1 %v365_v55 }
 0x134   : > { %v346_v58 = vpop.xlane.xlu0 %345 }
 0x135   : > { %v368_v59 = vmul.f32 0.03125, %v346_v58 }
 0x137   : > { %v376_v60 = vadd.f32 1e-05, %v368_v59 }
 0x138   : > { %v349_v61 = vpop.xlane.xlu1 %348  ;;  %v352_v62 = vpop.xlane.xlu0 %351 }
 0x139   : > { %883 = vrsqrt.f32 %v376_v60  ;;  %v369_v63 = vmul.f32 0.03125, %v349_v61  ;;  %v370_v3 = vmul.f32 0.03125, %v352_v62 }
 0x13b   : > { %v377_v4 = vadd.f32 1e-05, %v369_v63  ;;  %v378_v6 = vadd.f32 1e-05, %v370_v3 }
 0x13c   : > { %v355_v7 = vpop.xlane.xlu1 %354  ;;  %v358_v10 = vpop.xlane.xlu0 %357 }
 0x13d   : > { %885 = vrsqrt.f32 %v377_v4  ;;  %v371_v11 = vmul.f32 0.03125, %v355_v7  ;;  %v372_v14 = vmul.f32 0.03125, %v358_v10  ;;  %v878_v7 = vld [vmem:[%s1134_s5 + $0x18] sm:$0xff]   ;;  %v879_v10 = vld [vmem:[%s1134_s5 + $0x20] sm:$0xff]  }
 0x13e   : > { %887 = vrsqrt.f32 %v378_v6  ;;  %v877_v6 = vld [vmem:[%s1134_s5 + $0x10] sm:$0xff]  }
 0x13f   : > { %v379_v15 = vadd.f32 1e-05, %v371_v11  ;;  %v380_v16 = vadd.f32 1e-05, %v372_v14  ;;  %v880_v11 = vld [vmem:[%s1134_s5 + $0x28] sm:$0xff]   ;;  %v881_v14 = vld [vmem:[%s1134_s5 + $0x30] sm:$0xff]  }
 0x140   : > { %v361_v17 = vpop.xlane.xlu1 %360  ;;  %v364_v18 = vpop.xlane.xlu0 %363 }
 0x141   : > { %889 = vrsqrt.f32 %v379_v15  ;;  %v373_v19 = vmul.f32 0.03125, %v361_v17  ;;  %v374_v22 = vmul.f32 0.03125, %v364_v18  ;;  %v882_v15 = vld [vmem:[%s1134_s5 + $0x38] sm:$0xff]   ;;  %v793_v17 = vld [vmem:[%s1133_s4] ss:$0 sm:$0xff] }
 0x142   : > { %891 = vrsqrt.f32 %v380_v16 }
 0x143   : > { %v884_v23 = vpop.eup %883  ;;  %v381_v24 = vadd.f32 1e-05, %v373_v19  ;;  %v382_v25 = vadd.f32 1e-05, %v374_v22 }
 0x144   : > { %v367_v26 = vpop.xlane.xlu1 %366  ;;  %v392_v27 = vmul.f32 %v884_v23, %v1004_v20  ;;  %v792_v20 = vld [vmem:[%s1131_s2] ss:$0 sm:$0xff] }
 0x145   : > { %893 = vrsqrt.f32 %v381_v24  ;;  %v375_v30 = vmul.f32 0.03125, %v367_v26 }
 0x146   : > { %895 = vrsqrt.f32 %v382_v25  ;;  %v407_v36 = vmul.f32 %v791_v31, %v392_v27 }
 0x147   : > { %v886_v32 = vpop.eup %885  ;;  %v383_v33 = vadd.f32 1e-05, %v375_v30 }
 0x148   : > { %v888_v34 = vpop.eup %887  ;;  %v393_v35 = vmul.f32 %v886_v32, %v1014_v28  ;;  %v422_v44 = vadd.f32 %v792_v20, %v407_v36 }
 0x149   : > { %v394_v37 = vmul.f32 %v888_v34, %v1007_v21  ;;  %897 = vrsqrt.f32 %v383_v33 }
 0x14a   : > { %v408_v40 = vmul.f32 %v791_v31, %v393_v35 }
 0x14b   : > { %v890_v41 = vpop.eup %889  ;;  %v409_v46 = vmul.f32 %v791_v31, %v394_v37 }
 0x14c   : > { %v892_v42 = vpop.eup %891  ;;  %v395_v43 = vmul.f32 %v890_v41, %v1017_v29  ;;  %v423_v45 = vadd.f32 %v792_v20, %v408_v40 }
 0x14d   : > { %v396_v47 = vmul.f32 %v892_v42, %v1026_v38  ;;  %v424_v53 = vadd.f32 %v792_v20, %v409_v46 }
 0x14e   : > { %v430_v50 = vpack.c.bf16 %v423_v45, %v422_v44  ;;  %v410_v28 = vmul.f32 %v791_v31, %v395_v43 }
 0x14f   : > { %v894_v51 = vpop.eup %893  ;;  %v411_v55 = vmul.f32 %v791_v31, %v396_v47 }
 0x150   : > { %v896_v52 = vpop.eup %895  ;;  %v397_v21 = vmul.f32 %v894_v51, %v1029_v39  ;;  %833 = vmatprep.mubr.msk.bf16.mxu0 %vm295_vm0, %v430_v50  ;;  %v425_v54 = vadd.f32 %v792_v20, %v410_v28 }
 0x151   : > { %v398_v56 = vmul.f32 %v896_v52, %v1038_v48  ;;  %v426_v38 = vadd.f32 %v792_v20, %v411_v55  ;;  %v875_v48 = vld [vmem:[%s1134_s5] sm:$0xff]  }
 0x152   : > { %v431_v57 = vpack.c.bf16 %v425_v54, %v424_v53  ;;  %v412_v29 = vmul.f32 %v791_v31, %v397_v21  ;;  %841 = vmatprep.subr.bf16.mxu1 %v875_v48 }
 0x153   : > { %v898_v58 = vpop.eup %897  ;;  %v413_v61 = vmul.f32 %v791_v31, %v398_v56  ;;  %842 = vmatpush3.bf16.msra.mxu1 %v875_v48 }
 0x154   : > { %v399_v59 = vmul.f32 %v898_v58, %v1041_v49  ;;  %834 = vmatmul.mubr.msk.bf16.vlgmr.msra.gmra.mrb[0].mxu0 %vm295_vm0, %v431_v57  ;;  %v427_v60 = vadd.f32 %v792_v20, %v412_v29  ;;  %v876_v49 = vld [vmem:[%s1134_s5 + $0x8] sm:$0xff]  }
 0x155   : > { %v428_v39 = vadd.f32 %v792_v20, %v413_v61  ;;  %843 = vmatprep.subr.bf16.mxu1 %v876_v49 }
 0x156   : > { %v432_v62 = vpack.c.bf16 %v427_v60, %v426_v38  ;;  %v414_v63 = vmul.f32 %v791_v31, %v399_v59 }
 0x157   : > { %844 = vmatpush3.bf16.msra.mxu1 %v876_v49 }
 0x158   : > { %837 = vmatprep.mubr.msk.bf16.mxu0 %vm295_vm0, %v432_v62  ;;  %v429_v3 = vadd.f32 %v792_v20, %v414_v63  ;;  %845 = vmatprep.subr.bf16.mxu1 %v877_v6 }
 0x15a   : > { %v433_v4 = vpack.c.bf16 %v429_v3, %v428_v39 }
 0x15b   : > { %846 = vmatpush3.bf16.msra.mxu1 %v877_v6 }
 0x15c   : > { %838 = vmatmul.mubr.msk.bf16.gmra.mrb[4].mxu0 %vm295_vm0, %v433_v4  ;;  %847 = vmatprep.subr.bf16.mxu1 %v878_v7 }
 0x15f   : > { %848 = vmatpush3.bf16.msra.mxu1 %v878_v7 }
 0x160   : > { %849 = vmatprep.subr.bf16.mxu1 %v879_v10 }
 0x163   : > { %850 = vmatpush3.bf16.msra.mxu1 %v879_v10 }
 0x164   : > { %851 = vmatprep.subr.bf16.mxu1 %v880_v11 }
 0x167   : > { %852 = vmatpush3.bf16.msra.mxu1 %v880_v11 }
 0x168   : > { %853 = vmatprep.subr.bf16.mxu1 %v881_v14 }
 0x16b   : > { %854 = vmatpush3.bf16.msra.mxu1 %v881_v14 }
 0x16c   : > { %855 = vmatprep.subr.bf16.mxu1 %v882_v15 }
 0x16f   : > { %856 = vmatpush3.bf16.msra.mxu1 %v882_v15 }
 0x227   : > { %v835_v16 = vpop.f32.mrb[0].mxu0 }
 0x228   : > { %v503_v18 = vpop.f32.mrb[1].mxu0  ;;  %v512_v22 = vadd.f32 %v835_v16, %v793_v17 }
 0x229   : > { %v836_v19 = vpop.f32.mrb[2].mxu0  ;;  %v504_v25 = vadd.f32 %v793_v17, %v503_v18 }
 0x22a   : > { %v515_v23 = vadd.f32 %v836_v19, %v793_v17  ;;  %v506_v24 = vpop.f32.mrb[3].mxu0 }
 0x22b   : > { %v507_v26 = vadd.f32 %v793_v17, %v506_v24 }
 0x22c   : > { %v535_v27 = vpack.c.bf16 %v515_v23, %v512_v22 }
 0x22d   : > { %v534_v30 = vpack.c.bf16 %v507_v26, %v504_v25 }
 0x22e   : > { %v539_v31 = vmul.bf16 %v535_v27, %v535_v27 }
 0x22f   : > { %v538_v32 = vmul.bf16 %v534_v30, %v534_v30  ;;  %v839_v33 = vpop.f32.mrb[4].mxu0 }
 0x230   : > { %v543_v34 = vmul.bf16 %v539_v31, %v535_v27  ;;  %v519_v35 = vpop.f32.mrb[5].mxu0  ;;  %v528_v40 = vadd.f32 %v839_v33, %v793_v17 }
 0x231   : > { %v840_v36 = vpop.f32.mrb[6].mxu0  ;;  %v542_v37 = vmul.bf16 %v538_v32, %v534_v30  ;;  %v520_v43 = vadd.f32 %v793_v17, %v519_v35 }
 0x232   : > { %v547_v20 = vmul.bf16 1027030327, %v543_v34  ;;  %v531_v41 = vadd.f32 %v840_v36, %v793_v17  ;;  %v522_v42 = vpop.f32.mrb[7].mxu0 }
 0x233   : > { %v523_v44 = vadd.f32 %v793_v17, %v522_v42  ;;  %v546_v45 = vmul.bf16 1027030327, %v542_v37  ;;  %v800_v17 = vld [vmem:[%s1135_s6] ss:$0 sm:$0xff] }
 0x234   : > { %v537_v46 = vpack.c.bf16 %v531_v41, %v528_v40  ;;  %v551_v47 = vadd.bf16 %v547_v20, %v535_v27 }
 0x235   : > { %v536_v50 = vpack.c.bf16 %v523_v44, %v520_v43  ;;  %v550_v28 = vadd.bf16 %v546_v45, %v534_v30 }
 0x236   : > { %v541_v51 = vmul.bf16 %v537_v46, %v537_v46  ;;  %v555_v52 = vmul.bf16 1061961548, %v551_v47 }
 0x237   : > { %v540_v21 = vmul.bf16 %v536_v50, %v536_v50  ;;  %v554_v53 = vmul.bf16 1061961548, %v550_v28 }
 0x238   : > { %v545_v54 = vmul.bf16 %v541_v51, %v537_v46  ;;  %899 = vtanh.bf16 %v555_v52 }
 0x239   : > { %v544_v55 = vmul.bf16 %v540_v21, %v536_v50  ;;  %901 = vtanh.bf16 %v554_v53 }
 0x23a   : > { %v549_v56 = vmul.bf16 1027030327, %v545_v54 }
 0x23b   : > { %v548_v57 = vmul.bf16 1027030327, %v544_v55 }
 0x23c   : > { %v553_v29 = vadd.bf16 %v549_v56, %v537_v46 }
 0x23d   : > { %v552_v58 = vadd.bf16 %v548_v57, %v536_v50 }
 0x23e   : > { %v557_v59 = vmul.bf16 1061961548, %v553_v29 }
 0x23f   : > { %v556_v38 = vmul.bf16 1061961548, %v552_v58 }
 0x240   : > { %903 = vtanh.bf16 %v557_v59 }
 0x241   : > { %905 = vtanh.bf16 %v556_v38 }
 0x243   : > { %v900_v60 = vpop.eup %899 }
 0x244   : > { %v902_v61 = vpop.eup %901  ;;  %v563_v62 = vadd.bf16 1065369472, %v900_v60 }
 0x245   : > { %v562_v63 = vadd.bf16 1065369472, %v902_v61 }
 0x246   : > { %v567_v39 = vmul.bf16 1056980736, %v563_v62 }
 0x247   : > { %v566_v3 = vmul.bf16 1056980736, %v562_v63 }
 0x248   : > { %v571_v48 = vmul.bf16 %v567_v39, %v535_v27 }
 0x249   : > { %v570_v4 = vmul.bf16 %v566_v3, %v534_v30 }
 0x24b   : > { %v904_v49 = vpop.eup %903  ;;  %857 = vmatprep.mubr.bf16.mxu1 %v570_v4 }
 0x24c   : > { %v906_v6 = vpop.eup %905  ;;  %858 = vmatmul.mubr.bf16.vlgmr.msra.gmra.mrb[0].mxu1 %v571_v48  ;;  %v565_v7 = vadd.bf16 1065369472, %v904_v49 }
 0x24d   : > { %v564_v10 = vadd.bf16 1065369472, %v906_v6 }
 0x24e   : > { %v569_v11 = vmul.bf16 1056980736, %v565_v7 }
 0x24f   : > { %v568_v14 = vmul.bf16 1056980736, %v564_v10 }
 0x250   : > { %v573_v16 = vmul.bf16 %v569_v11, %v537_v46 }
 0x251   : > { %v572_v15 = vmul.bf16 %v568_v14, %v536_v50 }
 0x253   : > { %861 = vmatprep.mubr.bf16.mxu1 %v572_v15 }
 0x254   : > { %862 = vmatmul.mubr.bf16.gmra.mrb[4].mxu1 %v573_v16 }
 0x31f   : > { %v859_v18 = vpop.f32.mrb[0].mxu1 }
 0x320   : > { %v688_v19 = vadd.f32 %v859_v18, %v800_v17  ;;  %v679_v22 = vpop.f32.mrb[1].mxu1 }
 0x321   : > { %v680_v23 = vadd.f32 %v800_v17, %v679_v22  ;;  %v860_v24 = vpop.f32.mrb[2].mxu1 }
 0x322   : > { %v712_v25 = vadd.f32 %v688_v19, %v973_v1  ;;  %v691_v26 = vadd.f32 %v860_v24, %v800_v17  ;;  %v682_v27 = vpop.f32.mrb[3].mxu1 }
 0x323   : > { %v710_v30 = vadd.f32 %v680_v23, %v971_v0  ;;  %v683_v31 = vadd.f32 %v800_v17, %v682_v27 }
 0x324   : > { %720 = vst.msk [vmem:[%s280_s18 + $0x10] sm:$0xff] %vm295_vm0, %v712_v25  ;;  %v713_v32 = vadd.f32 %v691_v26, %v981_v5 }
 0x325   : > { %718 = vst.msk [vmem:[%s280_s18] sm:$0xff] %vm295_vm0, %v710_v30  ;;  %v711_v33 = vadd.f32 %v683_v31, %v975_v2 }
 0x326   : > { %721 = vst.msk [vmem:[%s280_s18 + $0x18] sm:$0xff] %vm295_vm0, %v713_v32 }
 0x327   : > { %719 = vst.msk [vmem:[%s280_s18 + $0x8] sm:$0xff] %vm295_vm0, %v711_v33  ;;  %v863_v34 = vpop.f32.mrb[4].mxu1 }
 0x328   : > { %v704_v35 = vadd.f32 %v863_v34, %v800_v17  ;;  %v695_v1 = vpop.f32.mrb[5].mxu1 }
 0x329   : > { %v696_v36 = vadd.f32 %v800_v17, %v695_v1  ;;  %v864_v37 = vpop.f32.mrb[6].mxu1 }
 0x32a   : > { %v716_v0 = vadd.f32 %v704_v35, %v995_v12  ;;  %v707_v20 = vadd.f32 %v864_v37, %v800_v17  ;;  %v698_v40 = vpop.f32.mrb[7].mxu1 }
 0x32b   : > { %v714_v41 = vadd.f32 %v696_v36, %v987_v8  ;;  %v699_v5 = vadd.f32 %v800_v17, %v698_v40 }
 0x32c   : > { %724 = vst.msk [vmem:[%s280_s18 + $0x30] sm:$0xff] %vm295_vm0, %v716_v0  ;;  %v717_v2 = vadd.f32 %v707_v20, %v997_v13 }
 0x32d   : > { %722 = vst.msk [vmem:[%s280_s18 + $0x20] sm:$0xff] %vm295_vm0, %v714_v41  ;;  %v715_v42 = vadd.f32 %v699_v5, %v989_v9 }
 0x32e   : > { %725 = vst.msk [vmem:[%s280_s18 + $0x38] sm:$0xff] %vm295_vm0, %v717_v2 }
 0x32f   : > { %723 = vst.msk [vmem:[%s280_s18 + $0x28] sm:$0xff] %vm295_vm0, %v715_v42 }
 0x330 PF: > { %s17_s24 = sadd.s32 1, %s913_s24  }
 0x331   : > { %p14_p4 = scmp.ge.s32.totalorder %s17_s24, 4  }
 0x333   :  { %16 = sbr.rel (!%p14_p4) target bundleno = 1 (0x1), region = 78 }

// kernel: tpu_custom_call.1
= control target key start
LH: loop header
LB: loop body
LE: loop exit
PB: predicated region body
PF: predicated region fallthrough
CT: control target
= control target key end

     0   :  { %s955_s24 = smov 0   ;;  %s1129_s0 = inlined_call_operand.vmem [shape: f32[128,32], index: 0, kind: input, shape index: {}]   ;;  %s1130_s1 = inlined_call_operand.vmem [shape: f32[1,32], index: 1, kind: input, shape index: {}]   ;;  %s1131_s2 = inlined_call_operand.vmem [shape: f32[1,32], index: 2, kind: input, shape index: {}]   ;;  %s1132_s3 = inlined_call_operand.vmem [shape: bf16[32,128], index: 3, kind: input, shape index: {}]   ;;  %s1133_s4 = inlined_call_operand.vmem [shape: f32[1,128], index: 4, kind: input, shape index: {}]   ;;  %s1134_s5 = inlined_call_operand.vmem [shape: bf16[128,32], index: 5, kind: input, shape index: {}]   ;;  %s1135_s6 = inlined_call_operand.vmem [shape: f32[1,32], index: 6, kind: input, shape index: {}]   ;;  %s1136_s7 = inlined_call_operand.vmem [shape: f32[128,32], index: 7, kind: output, shape index: {}]  }
   0x1 LB: > { %s782_s25 = sadd.s32 4294967295, %s913_s24   ;;  %p786_p0 = scmp.ge.s32.totalorder %s913_s24, 1  ;;  %s913_s24 = sphi %s955_s24, %s17_s24  }
   0x2   : > { %p238_p1 = scmp.lt.s32.totalorder %s913_s24, 3 }
   0x4   : > { %p239_p2 = pnand %p786_p0, %p238_p1 }
   0x5   : > { %s787_s26 = sshll.u32 (!%p239_p2), %s782_s25, 3  ;;  %vm295_vm0 = vcmask (!%p239_p2), 261120   ;;  %v873_v56 = vld [vmem:[%s1132_s3] sm:$0xff] (!%p239_p2)   ;;  %v874_v57 = vld [vmem:[%s1132_s3 + $0x8] sm:$0xff] (!%p239_p2)  }
   0x6   : > { %242 = sbr.rel (%p239_p2) target bundleno = 816 (0x330), region = 48  ;;  %p271_p3 = scmp.lt.s32.totalorder (!%p239_p2), %s787_s26, 15  ;;  %829 = vmatprep.subr.bf16.mxu0 (!%p239_p2), %v873_v56 }
   0x7   : > { %830 = vmatpush3.bf16.msra.mxu0 (!%p239_p2), %v873_v56 }
   0x8   : > { %831 = vmatprep.subr.bf16.mxu0 (!%p239_p2), %v874_v57 }
   0xb   : > { %832 = vmatpush3.bf16.msra.mxu0 (!%p239_p2), %v874_v57 }
   0xd   : > { %s1138_s26 = smov (!%p271_p3, %s787_s26), 15 }
   0xe   : > { %s788_s27 = sshll.u32 %s1138_s26, 3 }
   0xf   : > { %s274_s30 = scalar_lea.vmem %s1129_s0, %s788_s27  ;;  %s280_s18 = scalar_lea.vmem %s1136_s7, %s788_s27 }
  0x10   : > { %v971_v0 = vld [vmem:[%s274_s30] sm:$0xff]  ;;  %v973_v1 = vld [vmem:[%s274_s30 + $0x10] sm:$0xff]  ;;  %v975_v2 = vld [vmem:[%s274_s30 + $0x8] sm:$0xff] }
  0x11   : > { %v296_v3 = vsel %vm295_vm0, %v971_v0, 0.0  ;;  %v302_v4 = vsel %vm295_vm0, %v973_v1, 0.0  ;;  %v981_v5 = vld [vmem:[%s274_s30 + $0x18] sm:$0xff]  ;;  %v299_v6 = vsel %vm295_vm0, %v975_v2, 0.0  ;;  %v987_v8 = vld [vmem:[%s274_s30 + $0x20] sm:$0xff]  ;;  %v989_v9 = vld [vmem:[%s274_s30 + $0x28] sm:$0xff] }
  0x12   : > { %297 = vadd.xlane.f32.xlu0 %v296_v3  ;;  %303 = vadd.xlane.f32.xlu1 %v302_v4  ;;  %v305_v7 = vsel %vm295_vm0, %v981_v5, 0.0  ;;  %v308_v10 = vsel %vm295_vm0, %v987_v8, 0.0  ;;  %v311_v11 = vsel %vm295_vm0, %v989_v9, 0.0  ;;  %v995_v12 = vld [vmem:[%s274_s30 + $0x30] sm:$0xff]  ;;  %v997_v13 = vld [vmem:[%s274_s30 + $0x38] sm:$0xff] }
  0x13   : > { %v314_v14 = vsel %vm295_vm0, %v995_v12, 0.0  ;;  %v317_v15 = vsel %vm295_vm0, %v997_v13, 0.0 }
  0x16   : > { %300 = vadd.xlane.f32.xlu0 %v299_v6  ;;  %306 = vadd.xlane.f32.xlu1 %v305_v7 }
  0x1a   : > { %309 = vadd.xlane.f32.xlu0 %v308_v10  ;;  %312 = vadd.xlane.f32.xlu1 %v311_v11 }
  0x1e   : > { %315 = vadd.xlane.f32.xlu0 %v314_v14  ;;  %318 = vadd.xlane.f32.xlu1 %v317_v15 }
  0x9f   : > { %v298_v16 = vpop.xlane.xlu0 %297  ;;  %v304_v17 = vpop.xlane.xlu1 %303 }
  0xa0   : > { %v320_v18 = vmul.f32 0.03125, %v298_v16  ;;  %v322_v19 = vmul.f32 0.03125, %v304_v17 }
  0xa2   : > { %v1004_v20 = vsub.f32 %v971_v0, %v320_v18  ;;  %v1007_v21 = vsub.f32 %v973_v1, %v322_v19 }
  0xa3   : > { %v301_v22 = vpop.xlane.xlu0 %300  ;;  %v307_v23 = vpop.xlane.xlu1 %306 }
  0xa4   : > { %v321_v24 = vmul.f32 0.03125, %v301_v22  ;;  %v323_v25 = vmul.f32 0.03125, %v307_v23  ;;  %v336_v26 = vmul.f32 %v1004_v20, %v1004_v20  ;;  %v338_v27 = vmul.f32 %v1007_v21, %v1007_v21 }
  0xa6   : > { %v1014_v28 = vsub.f32 %v975_v2, %v321_v24  ;;  %v1017_v29 = vsub.f32 %v981_v5, %v323_v25  ;;  %v344_v30 = vsel %vm295_vm0, %v336_v26, 0.0  ;;  %v350_v33 = vsel %vm295_vm0, %v338_v27, 0.0 }
  0xa7   : > { %345 = vadd.xlane.f32.xlu0 %v344_v30  ;;  %v310_v31 = vpop.xlane.xlu0 %309  ;;  %v313_v32 = vpop.xlane.xlu1 %312 }
  0xa8   : > { %v324_v34 = vmul.f32 0.03125, %v310_v31  ;;  %v325_v35 = vmul.f32 0.03125, %v313_v32  ;;  %v337_v36 = vmul.f32 %v1014_v28, %v1014_v28  ;;  %v339_v37 = vmul.f32 %v1017_v29, %v1017_v29  ;;  %v791_v31 = vld [vmem:[%s1130_s1] ss:$0 sm:$0xff] }
  0xaa   : > { %v1026_v38 = vsub.f32 %v987_v8, %v324_v34  ;;  %v1029_v39 = vsub.f32 %v989_v9, %v325_v35  ;;  %v347_v40 = vsel %vm295_vm0, %v337_v36, 0.0  ;;  %v353_v43 = vsel %vm295_vm0, %v339_v37, 0.0 }
  0xab   : > { %351 = vadd.xlane.f32.xlu0 %v350_v33  ;;  %348 = vadd.xlane.f32.xlu1 %v347_v40  ;;  %v316_v41 = vpop.xlane.xlu0 %315  ;;  %v319_v42 = vpop.xlane.xlu1 %318 }
  0xac   : > { %v326_v44 = vmul.f32 0.03125, %v316_v41  ;;  %v327_v45 = vmul.f32 0.03125, %v319_v42  ;;  %v340_v46 = vmul.f32 %v1026_v38, %v1026_v38  ;;  %v341_v47 = vmul.f32 %v1029_v39, %v1029_v39 }
  0xae   : > { %v1038_v48 = vsub.f32 %v995_v12, %v326_v44  ;;  %v1041_v49 = vsub.f32 %v997_v13, %v327_v45  ;;  %v356_v50 = vsel %vm295_vm0, %v340_v46, 0.0  ;;  %v359_v51 = vsel %vm295_vm0, %v341_v47, 0.0 }
  0xaf   : > { %354 = vadd.xlane.f32.xlu1 %v353_v43  ;;  %357 = vadd.xlane.f32.xlu0 %v356_v50 }
  0xb0   : > { %v342_v52 = vmul.f32 %v1038_v48, %v1038_v48  ;;  %v343_v53 = vmul.f32 %v1041_v49, %v1041_v49 }
  0xb2   : > { %v362_v54 = vsel %vm295_vm0, %v342_v52, 0.0  ;;  %v365_v55 = vsel %vm295_vm0, %v343_v53, 0.0 }
  0xb3   : > { %360 = vadd.xlane.f32.xlu1 %v359_v51  ;;  %363 = vadd.xlane.f32.xlu0 %v362_v54 }
  0xb7   : > { %366 = vadd.xlane.f32.xlu1 %v365_v55 }
 0x134   : > { %v346_v58 = vpop.xlane.xlu0 %345 }
 0x135   : > { %v368_v59 = vmul.f32 0.03125, %v346_v58 }
 0x137   : > { %v376_v60 = vadd.f32 1e-05, %v368_v59 }
 0x138   : > { %v349_v61 = vpop.xlane.xlu1 %348  ;;  %v352_v62 = vpop.xlane.xlu0 %351 }
 0x139   : > { %883 = vrsqrt.f32 %v376_v60  ;;  %v369_v63 = vmul.f32 0.03125, %v349_v61  ;;  %v370_v3 = vmul.f32 0.03125, %v352_v62 }
 0x13b   : > { %v377_v4 = vadd.f32 1e-05, %v369_v63  ;;  %v378_v6 = vadd.f32 1e-05, %v370_v3 }
 0x13c   : > { %v355_v7 = vpop.xlane.xlu1 %354  ;;  %v358_v10 = vpop.xlane.xlu0 %357 }
 0x13d   : > { %885 = vrsqrt.f32 %v377_v4  ;;  %v371_v11 = vmul.f32 0.03125, %v355_v7  ;;  %v372_v14 = vmul.f32 0.03125, %v358_v10  ;;  %v878_v7 = vld [vmem:[%s1134_s5 + $0x18] sm:$0xff]   ;;  %v879_v10 = vld [vmem:[%s1134_s5 + $0x20] sm:$0xff]  }
 0x13e   : > { %887 = vrsqrt.f32 %v378_v6  ;;  %v877_v6 = vld [vmem:[%s1134_s5 + $0x10] sm:$0xff]  }
 0x13f   : > { %v379_v15 = vadd.f32 1e-05, %v371_v11  ;;  %v380_v16 = vadd.f32 1e-05, %v372_v14  ;;  %v880_v11 = vld [vmem:[%s1134_s5 + $0x28] sm:$0xff]   ;;  %v881_v14 = vld [vmem:[%s1134_s5 + $0x30] sm:$0xff]  }
 0x140   : > { %v361_v17 = vpop.xlane.xlu1 %360  ;;  %v364_v18 = vpop.xlane.xlu0 %363 }
 0x141   : > { %889 = vrsqrt.f32 %v379_v15  ;;  %v373_v19 = vmul.f32 0.03125, %v361_v17  ;;  %v374_v22 = vmul.f32 0.03125, %v364_v18  ;;  %v882_v15 = vld [vmem:[%s1134_s5 + $0x38] sm:$0xff]   ;;  %v793_v17 = vld [vmem:[%s1133_s4] ss:$0 sm:$0xff] }
 0x142   : > { %891 = vrsqrt.f32 %v380_v16 }
 0x143   : > { %v884_v23 = vpop.eup %883  ;;  %v381_v24 = vadd.f32 1e-05, %v373_v19  ;;  %v382_v25 = vadd.f32 1e-05, %v374_v22 }
 0x144   : > { %v367_v26 = vpop.xlane.xlu1 %366  ;;  %v392_v27 = vmul.f32 %v884_v23, %v1004_v20  ;;  %v792_v20 = vld [vmem:[%s1131_s2] ss:$0 sm:$0xff] }
 0x145   : > { %893 = vrsqrt.f32 %v381_v24  ;;  %v375_v30 = vmul.f32 0.03125, %v367_v26 }
 0x146   : > { %895 = vrsqrt.f32 %v382_v25  ;;  %v407_v36 = vmul.f32 %v791_v31, %v392_v27 }
 0x147   : > { %v886_v32 = vpop.eup %885  ;;  %v383_v33 = vadd.f32 1e-05, %v375_v30 }
 0x148   : > { %v888_v34 = vpop.eup %887  ;;  %v393_v35 = vmul.f32 %v886_v32, %v1014_v28  ;;  %v422_v44 = vadd.f32 %v792_v20, %v407_v36 }
 0x149   : > { %v394_v37 = vmul.f32 %v888_v34, %v1007_v21  ;;  %897 = vrsqrt.f32 %v383_v33 }
 0x14a   : > { %v408_v40 = vmul.f32 %v791_v31, %v393_v35 }
 0x14b   : > { %v890_v41 = vpop.eup %889  ;;  %v409_v46 = vmul.f32 %v791_v31, %v394_v37 }
 0x14c   : > { %v892_v42 = vpop.eup %891  ;;  %v395_v43 = vmul.f32 %v890_v41, %v1017_v29  ;;  %v423_v45 = vadd.f32 %v792_v20, %v408_v40 }
 0x14d   : > { %v396_v47 = vmul.f32 %v892_v42, %v1026_v38  ;;  %v424_v53 = vadd.f32 %v792_v20, %v409_v46 }
 0x14e   : > { %v430_v50 = vpack.c.bf16 %v423_v45, %v422_v44  ;;  %v410_v28 = vmul.f32 %v791_v31, %v395_v43 }
 0x14f   : > { %v894_v51 = vpop.eup %893  ;;  %v411_v55 = vmul.f32 %v791_v31, %v396_v47 }
 0x150   : > { %v896_v52 = vpop.eup %895  ;;  %v397_v21 = vmul.f32 %v894_v51, %v1029_v39  ;;  %833 = vmatprep.mubr.msk.bf16.mxu0 %vm295_vm0, %v430_v50  ;;  %v425_v54 = vadd.f32 %v792_v20, %v410_v28 }
 0x151   : > { %v398_v56 = vmul.f32 %v896_v52, %v1038_v48  ;;  %v426_v38 = vadd.f32 %v792_v20, %v411_v55  ;;  %v875_v48 = vld [vmem:[%s1134_s5] sm:$0xff]  }
 0x152   : > { %v431_v57 = vpack.c.bf16 %v425_v54, %v424_v53  ;;  %v412_v29 = vmul.f32 %v791_v31, %v397_v21  ;;  %841 = vmatprep.subr.bf16.mxu1 %v875_v48 }
 0x153   : > { %v898_v58 = vpop.eup %897  ;;  %v413_v61 = vmul.f32 %v791_v31, %v398_v56  ;;  %842 = vmatpush3.bf16.msra.mxu1 %v875_v48 }
 0x154   : > { %v399_v59 = vmul.f32 %v898_v58, %v1041_v49  ;;  %834 = vmatmul.mubr.msk.bf16.vlgmr.msra.gmra.mrb[0].mxu0 %vm295_vm0, %v431_v57  ;;  %v427_v60 = vadd.f32 %v792_v20, %v412_v29  ;;  %v876_v49 = vld [vmem:[%s1134_s5 + $0x8] sm:$0xff]  }
 0x155   : > { %v428_v39 = vadd.f32 %v792_v20, %v413_v61  ;;  %843 = vmatprep.subr.bf16.mxu1 %v876_v49 }
 0x156   : > { %v432_v62 = vpack.c.bf16 %v427_v60, %v426_v38  ;;  %v414_v63 = vmul.f32 %v791_v31, %v399_v59 }
 0x157   : > { %844 = vmatpush3.bf16.msra.mxu1 %v876_v49 }
 0x158   : > { %837 = vmatprep.mubr.msk.bf16.mxu0 %vm295_vm0, %v432_v62  ;;  %v429_v3 = vadd.f32 %v792_v20, %v414_v63  ;;  %845 = vmatprep.subr.bf16.mxu1 %v877_v6 }
 0x15a   : > { %v433_v4 = vpack.c.bf16 %v429_v3, %v428_v39 }
 0x15b   : > { %846 = vmatpush3.bf16.msra.mxu1 %v877_v6 }
 0x15c   : > { %838 = vmatmul.mubr.msk.bf16.gmra.mrb[4].mxu0 %vm295_vm0, %v433_v4  ;;  %847 = vmatprep.subr.bf16.mxu1 %v878_v7 }
 0x15f   : > { %848 = vmatpush3.bf16.msra.mxu1 %v878_v7 }
 0x160   : > { %849 = vmatprep.subr.bf16.mxu1 %v879_v10 }
 0x163   : > { %850 = vmatpush3.bf16.msra.mxu1 %v879_v10 }
 0x164   : > { %851 = vmatprep.subr.bf16.mxu1 %v880_v11 }
 0x167   : > { %852 = vmatpush3.bf16.msra.mxu1 %v880_v11 }
 0x168   : > { %853 = vmatprep.subr.bf16.mxu1 %v881_v14 }
 0x16b   : > { %854 = vmatpush3.bf16.msra.mxu1 %v881_v14 }
 0x16c   : > { %855 = vmatprep.subr.bf16.mxu1 %v882_v15 }
 0x16f   : > { %856 = vmatpush3.bf16.msra.mxu1 %v882_v15 }
 0x227   : > { %v835_v16 = vpop.f32.mrb[0].mxu0 }
 0x228   : > { %v503_v18 = vpop.f32.mrb[1].mxu0  ;;  %v512_v22 = vadd.f32 %v835_v16, %v793_v17 }
 0x229   : > { %v836_v19 = vpop.f32.mrb[2].mxu0  ;;  %v504_v25 = vadd.f32 %v793_v17, %v503_v18 }
 0x22a   : > { %v515_v23 = vadd.f32 %v836_v19, %v793_v17  ;;  %v506_v24 = vpop.f32.mrb[3].mxu0 }
 0x22b   : > { %v507_v26 = vadd.f32 %v793_v17, %v506_v24 }
 0x22c   : > { %v535_v27 = vpack.c.bf16 %v515_v23, %v512_v22 }
 0x22d   : > { %v534_v30 = vpack.c.bf16 %v507_v26, %v504_v25 }
 0x22e   : > { %v539_v31 = vmul.bf16 %v535_v27, %v535_v27 }
 0x22f   : > { %v538_v32 = vmul.bf16 %v534_v30, %v534_v30  ;;  %v839_v33 = vpop.f32.mrb[4].mxu0 }
 0x230   : > { %v543_v34 = vmul.bf16 %v539_v31, %v535_v27  ;;  %v519_v35 = vpop.f32.mrb[5].mxu0  ;;  %v528_v40 = vadd.f32 %v839_v33, %v793_v17 }
 0x231   : > { %v840_v36 = vpop.f32.mrb[6].mxu0  ;;  %v542_v37 = vmul.bf16 %v538_v32, %v534_v30  ;;  %v520_v43 = vadd.f32 %v793_v17, %v519_v35 }
 0x232   : > { %v547_v20 = vmul.bf16 1027030327, %v543_v34  ;;  %v531_v41 = vadd.f32 %v840_v36, %v793_v17  ;;  %v522_v42 = vpop.f32.mrb[7].mxu0 }
 0x233   : > { %v523_v44 = vadd.f32 %v793_v17, %v522_v42  ;;  %v546_v45 = vmul.bf16 1027030327, %v542_v37  ;;  %v800_v17 = vld [vmem:[%s1135_s6] ss:$0 sm:$0xff] }
 0x234   : > { %v537_v46 = vpack.c.bf16 %v531_v41, %v528_v40  ;;  %v551_v47 = vadd.bf16 %v547_v20, %v535_v27 }
 0x235   : > { %v536_v50 = vpack.c.bf16 %v523_v44, %v520_v43  ;;  %v550_v28 = vadd.bf16 %v546_v45, %v534_v30 }
 0x236   : > { %v541_v51 = vmul.bf16 %v537_v46, %v537_v46  ;;  %v555_v52 = vmul.bf16 1061961548, %v551_v47 }
 0x237   : > { %v540_v21 = vmul.bf16 %v536_v50, %v536_v50  ;;  %v554_v53 = vmul.bf16 1061961548, %v550_v28 }
 0x238   : > { %v545_v54 = vmul.bf16 %v541_v51, %v537_v46  ;;  %899 = vtanh.bf16 %v555_v52 }
 0x239   : > { %v544_v55 = vmul.bf16 %v540_v21, %v536_v50  ;;  %901 = vtanh.bf16 %v554_v53 }
 0x23a   : > { %v549_v56 = vmul.bf16 1027030327, %v545_v54 }
 0x23b   : > { %v548_v57 = vmul.bf16 1027030327, %v544_v55 }
 0x23c   : > { %v553_v29 = vadd.bf16 %v549_v56, %v537_v46 }
 0x23d   : > { %v552_v58 = vadd.bf16 %v548_v57, %v536_v50 }
 0x23e   : > { %v557_v59 = vmul.bf16 1061961548, %v553_v29 }
 0x23f   : > { %v556_v38 = vmul.bf16 1061961548, %v552_v58 }
 0x240   : > { %903 = vtanh.bf16 %v557_v59 }
 0x241   : > { %905 = vtanh.bf16 %v556_v38 }
 0x243   : > { %v900_v60 = vpop.eup %899 }
 0x244   : > { %v902_v61 = vpop.eup %901  ;;  %v563_v62 = vadd.bf16 1065369472, %v900_v60 }
 0x245   : > { %v562_v63 = vadd.bf16 1065369472, %v902_v61 }
 0x246   : > { %v567_v39 = vmul.bf16 1056980736, %v563_v62 }
 0x247   : > { %v566_v3 = vmul.bf16 1056980736, %v562_v63 }
 0x248   : > { %v571_v48 = vmul.bf16 %v567_v39, %v535_v27 }
 0x249   : > { %v570_v4 = vmul.bf16 %v566_v3, %v534_v30 }
 0x24b   : > { %v904_v49 = vpop.eup %903  ;;  %857 = vmatprep.mubr.bf16.mxu1 %v570_v4 }
 0x24c   : > { %v906_v6 = vpop.eup %905  ;;  %858 = vmatmul.mubr.bf16.vlgmr.msra.gmra.mrb[0].mxu1 %v571_v48  ;;  %v565_v7 = vadd.bf16 1065369472, %v904_v49 }
 0x24d   : > { %v564_v10 = vadd.bf16 1065369472, %v906_v6 }
 0x24e   : > { %v569_v11 = vmul.bf16 1056980736, %v565_v7 }
 0x24f   : > { %v568_v14 = vmul.bf16 1056980736, %v564_v10 }
 0x250   : > { %v573_v16 = vmul.bf16 %v569_v11, %v537_v46 }
 0x251   : > { %v572_v15 = vmul.bf16 %v568_v14, %v536_v50 }
 0x253   : > { %861 = vmatprep.mubr.bf16.mxu1 %v572_v15 }
 0x254   : > { %862 = vmatmul.mubr.bf16.gmra.mrb[4].mxu1 %v573_v16 }
 0x31f   : > { %v859_v18 = vpop.f32.mrb[0].mxu1 }
 0x320   : > { %v688_v19 = vadd.f32 %v859_v18, %v800_v17  ;;  %v679_v22 = vpop.f32.mrb[1].mxu1 }
 0x321   : > { %v680_v23 = vadd.f32 %v800_v17, %v679_v22  ;;  %v860_v24 = vpop.f32.mrb[2].mxu1 }
 0x322   : > { %v712_v25 = vadd.f32 %v688_v19, %v973_v1  ;;  %v691_v26 = vadd.f32 %v860_v24, %v800_v17  ;;  %v682_v27 = vpop.f32.mrb[3].mxu1 }
 0x323   : > { %v710_v30 = vadd.f32 %v680_v23, %v971_v0  ;;  %v683_v31 = vadd.f32 %v800_v17, %v682_v27 }
 0x324   : > { %720 = vst.msk [vmem:[%s280_s18 + $0x10] sm:$0xff] %vm295_vm0, %v712_v25  ;;  %v713_v32 = vadd.f32 %v691_v26, %v981_v5 }
 0x325   : > { %718 = vst.msk [vmem:[%s280_s18] sm:$0xff] %vm295_vm0, %v710_v30  ;;  %v711_v33 = vadd.f32 %v683_v31, %v975_v2 }
 0x326   : > { %721 = vst.msk [vmem:[%s280_s18 + $0x18] sm:$0xff] %vm295_vm0, %v713_v32 }
 0x327   : > { %719 = vst.msk [vmem:[%s280_s18 + $0x8] sm:$0xff] %vm295_vm0, %v711_v33  ;;  %v863_v34 = vpop.f32.mrb[4].mxu1 }
 0x328   : > { %v704_v35 = vadd.f32 %v863_v34, %v800_v17  ;;  %v695_v1 = vpop.f32.mrb[5].mxu1 }
 0x329   : > { %v696_v36 = vadd.f32 %v800_v17, %v695_v1  ;;  %v864_v37 = vpop.f32.mrb[6].mxu1 }
 0x32a   : > { %v716_v0 = vadd.f32 %v704_v35, %v995_v12  ;;  %v707_v20 = vadd.f32 %v864_v37, %v800_v17  ;;  %v698_v40 = vpop.f32.mrb[7].mxu1 }
 0x32b   : > { %v714_v41 = vadd.f32 %v696_v36, %v987_v8  ;;  %v699_v5 = vadd.f32 %v800_v17, %v698_v40 }
 0x32c   : > { %724 = vst.msk [vmem:[%s280_s18 + $0x30] sm:$0xff] %vm295_vm0, %v716_v0  ;;  %v717_v2 = vadd.f32 %v707_v20, %v997_v13 }
 0x32d   : > { %722 = vst.msk [vmem:[%s280_s18 + $0x20] sm:$0xff] %vm295_vm0, %v714_v41  ;;  %v715_v42 = vadd.f32 %v699_v5, %v989_v9 }
 0x32e   : > { %725 = vst.msk [vmem:[%s280_s18 + $0x38] sm:$0xff] %vm295_vm0, %v717_v2 }
 0x32f   : > { %723 = vst.msk [vmem:[%s280_s18 + $0x28] sm:$0xff] %vm295_vm0, %v715_v42 }
 0x330 PF: > { %s17_s24 = sadd.s32 1, %s913_s24  }
 0x331   : > { %p14_p4 = scmp.ge.s32.totalorder %s17_s24, 4  }
 0x333   :  { %16 = sbr.rel (!%p14_p4) target bundleno = 1 (0x1), region = 78 }

</bundles_post_ra>
